<compile_context>
chip_gen: v7x
topology: tpu7x:2x2x1
jax: 0.10.0
libtpu: 0.0.40
codegen_flags: <defaults>
</compile_context>

<pallas_src>
import functools

import jax
import jax.numpy as jnp
from jax.experimental import pallas as pl
from jax.experimental.pallas import tpu as pltpu

_FUSED_GATHER_MAX_VOCAB = 512   # one-hot-matmul gather only makes sense for small tables


# --------------------------------------------------------------------------- #
# Kernel bodies
# --------------------------------------------------------------------------- #
def _halo_masks(m, seq_len, valid_len):
    """Per-row keep masks for the +/-1 conv halo (block = whole padded sequences).

    seq_len   : padded sequence length (rows per sequence inside the block)
    valid_len : real sequence length (conv zero-padding boundary)
    """
    pos = jax.lax.broadcasted_iota(jnp.int32, (m, 1), 0) % seq_len
    keep_prev = (pos != 0).astype(jnp.float32)              # no left neighbor at l == 0
    keep_next = (pos != valid_len - 1).astype(jnp.float32)  # no right neighbor at l == L-1
    return keep_prev, keep_next


def _conv_stack(act, layers, o_ref, keep_prev, keep_next):
    """Three conv1d(k=3, pad=1) + ReLU layers on an (M, C) f32 activation slab.

    Each layer is ONE fused matmul: shifted activations stacked on K -> (M, 3C) bf16,
    weight (3C, C) bf16 (taps 0/1/2 stacked in rows), f32 accumulation.
    """
    m = act.shape[0]

    def conv_relu(a, w_ref, b_ref):
        # Shifts via XLU rolls (aligned ops, no off-by-one sublane slices); boundary
        # contributions zeroed with position masks BEFORE the matmul.
        prev = pltpu.roll(a, shift=1, axis=0) * keep_prev        # row l sees a[l-1]
        nxt = pltpu.roll(a, shift=m - 1, axis=0) * keep_next     # row l sees a[l+1]
        x3 = jnp.concatenate(
            [prev.astype(jnp.bfloat16), a.astype(jnp.bfloat16), nxt.astype(jnp.bfloat16)],
            axis=1)                                              # (M, 3C) bf16, im2col
        y = jnp.dot(x3, w_ref[...], preferred_element_type=jnp.float32) + b_ref[...]
        return jnp.maximum(y, 0.0)

    a = act
    for w_ref, b_ref in layers:
        a = conv_relu(a, w_ref, b_ref)
    o_ref[...] = a.astype(o_ref.dtype)


def _target_rep_fused_kernel(ids_ref, tab_ref, w1_ref, b1_ref, w2_ref, b2_ref,
                             w3_ref, b3_ref, o_ref, *, seq_len, valid_len):
    """Fused-gather path: ids (M,1) int32 + resident bf16 table (Vp, C)."""
    m = ids_ref.shape[0]
    vp = tab_ref.shape[0]

    # Exact gather as a one-hot matmul on the MXU (each output row copies exactly one
    # bf16 table row).  Eliminates the HBM round trip of the (B, L, C) embedding.
    ids = ids_ref[...]                                            # (M, 1) int32
    onehot = jnp.where(ids == jax.lax.broadcasted_iota(jnp.int32, (m, vp), 1),
                       1.0, 0.0).astype(jnp.bfloat16)             # (M, Vp)
    a = jnp.dot(onehot, tab_ref[...], preferred_element_type=jnp.float32)  # (M, C) f32

    keep_prev, keep_next = _halo_masks(m, seq_len, valid_len)
    _conv_stack(a, ((w1_ref, b1_ref), (w2_ref, b2_ref), (w3_ref, b3_ref)),
                o_ref, keep_prev, keep_next)


def _target_rep_kernel(x_ref, w1_ref, b1_ref, w2_ref, b2_ref, w3_ref, b3_ref,
                       o_ref, *, seq_len, valid_len):
    """Pre-gathered path (large vocab): x_ref holds bf16 embedded rows (M, C)."""
    a = x_ref[...].astype(jnp.float32)
    keep_prev, keep_next = _halo_masks(x_ref.shape[0], seq_len, valid_len)
    _conv_stack(a, ((w1_ref, b1_ref), (w2_ref, b2_ref), (w3_ref, b3_ref)),
                o_ref, keep_prev, keep_next)


# --------------------------------------------------------------------------- #
# Wrapper
# --------------------------------------------------------------------------- #
def _vmem_limit_bytes():
    # ~80 MiB on v5e/v6e (128 MiB VMEM), ~40 MiB on v7x (64 MiB VMEM).
    try:
        cap = int(pltpu.get_tpu_info().vmem_capacity_bytes)
    except Exception:
        cap = 64 * 1024 * 1024
    return min(cap * 5 // 8, 96 * 1024 * 1024)


@jax.jit
def target_representation_old(x_ids, embed_table, w1, b1, w2, b2, w3, b3):
    """JAX/Pallas forward pass.

    x_ids       : (B, L) int32 token ids
    embed_table : (vocab_size, C) f32, row 0 all-zero (padding_idx=0)
    w*          : (3, C, C) f32  (tap k maps in->out channels for x[l+k-1]), b*: (C,)
    returns     : (B, L, C) f32
    """
    B, L = x_ids.shape
    V, C = embed_table.shape

    fuse_gather = V <= _FUSED_GATHER_MAX_VOCAB
    Vp = pl.cdiv(V, 128) * 128 if fuse_gather else V

    # --- tiling: whole padded sequences per block, VMEM-derived row budget -------
    Lp = pl.cdiv(L, 8) * 8                 # sublane-legal rows for any BT (no BT=B fallback)
    vmem_limit = _vmem_limit_bytes()
    # approx bytes/row: ids+out blocks (double-buffered) + in-kernel f32/bf16 temporaries
    bytes_per_row = 40 * C + 16 + (2 * Vp if fuse_gather else 4 * C)
    fixed_bytes = 2 * 3 * (3 * C * C * 2 + C * 4) + (2 * Vp * C * 2 if fuse_gather else 0)
    rows_budget = min(8192, max(Lp, (vmem_limit - fixed_bytes) // bytes_per_row))
    BT = max(1, min(B, rows_budget // Lp))       # batch elements per grid step
    target_steps = min(B, 4)                     # >=2 steps so both v7x TCs get work
    if target_steps > 1:
        BT = min(BT, max(1, B // target_steps))
    Bp = pl.cdiv(B, BT) * BT
    M = BT * Lp
    grid = (Bp // BT,)

    ids = jnp.pad(x_ids.astype(jnp.int32), ((0, Bp - B), (0, Lp - L)))

    w_cat = lambda w: w.reshape(3 * C, C).astype(jnp.bfloat16)   # taps stacked on K
    b_row = lambda b: b.reshape(1, C).astype(jnp.float32)

    w_spec = pl.BlockSpec((3 * C, C), lambda i: (0, 0))
    b_spec = pl.BlockSpec((1, C), lambda i: (0, 0))
    out_spec = pl.BlockSpec((M, C), lambda i: (i, 0))
    compiler_params = pltpu.CompilerParams(
        dimension_semantics=("parallel",),       # independent row slabs
        vmem_limit_bytes=vmem_limit)

    if fuse_gather:
        tab = jnp.pad(embed_table.astype(jnp.bfloat16), ((0, Vp - V), (0, 0)))
        out2d = pl.pallas_call(
            functools.partial(_target_rep_fused_kernel, seq_len=Lp, valid_len=L),
            out_shape=jax.ShapeDtypeStruct((Bp * Lp, C), jnp.float32),
            grid_spec=pltpu.PrefetchScalarGridSpec(
                num_scalar_prefetch=0,
                grid=grid,
                in_specs=[
                    pl.BlockSpec((M, 1), lambda i: (i, 0)),    # token ids (per block)
                    pl.BlockSpec((Vp, C), lambda i: (0, 0)),   # resident bf16 embed table
                    w_spec, b_spec,                            # conv 1
                    w_spec, b_spec,                            # conv 2
                    w_spec, b_spec,                            # conv 3
                ],
                out_specs=out_spec),
            compiler_params=compiler_params,
        )(ids.reshape(Bp * Lp, 1), tab,
          w_cat(w1), b_row(b1), w_cat(w2), b_row(b2), w_cat(w3), b_row(b3))
    else:
        # Large vocab: gather stays in XLA but from a pre-cast bf16 table (no f32
        # (B, L, C) intermediate is ever materialized).
        emb = jnp.take(embed_table.astype(jnp.bfloat16), ids, axis=0)   # (Bp, Lp, C)
        out2d = pl.pallas_call(
            functools.partial(_target_rep_kernel, seq_len=Lp, valid_len=L),
            out_shape=jax.ShapeDtypeStruct((Bp * Lp, C), jnp.float32),
            grid_spec=pltpu.PrefetchScalarGridSpec(
                num_scalar_prefetch=0,
                grid=grid,
                in_specs=[pl.BlockSpec((M, C), lambda i: (i, 0)),
                          w_spec, b_spec, w_spec, b_spec, w_spec, b_spec],
                out_specs=out_spec),
            compiler_params=compiler_params,
        )(emb.reshape(Bp * Lp, C),
          w_cat(w1), b_row(b1), w_cat(w2), b_row(b2), w_cat(w3), b_row(b3))

    return out2d.reshape(Bp, Lp, C)[:B, :L]


# --------------------------------------------------------------------------- #
# Reference & test harness
# --------------------------------------------------------------------------- #
def _reference(x_ids, embed_table, w1, b1, w2, b2, w3, b3):
    """Pure-JAX f32 reference (matches PyTorch Conv1d cross-correlation)."""
    emb = jnp.take(embed_table, x_ids, axis=0)  # (B, L, C)

    def conv_relu(a, w, b):
        a_prev = jnp.pad(a, ((0, 0), (1, 0), (0, 0)))[:, :-1, :]
        a_next = jnp.pad(a, ((0, 0), (0, 1), (0, 0)))[:, 1:, :]
        hi = jax.lax.Precision.HIGHEST
        y = (jnp.einsum("blc,cd->bld", a_prev, w[0], precision=hi)
             + jnp.einsum("blc,cd->bld", a, w[1], precision=hi)
             + jnp.einsum("blc,cd->bld", a_next, w[2], precision=hi)
             + b)
        return jnp.maximum(y, 0.0)

    a = conv_relu(emb, w1, b1)
    a = conv_relu(a, w2, b2)
    a = conv_relu(a, w3, b3)
    return a


def _init_params(key, vocab_size, embedding_num):
    """Deterministic synthetic parameters (shapes match the PyTorch module)."""
    C = embedding_num * 4
    keys = jax.random.split(key, 7)

    # nn.Embedding(vocab_size, C, padding_idx=0): normal init, row 0 zeroed.
    embed_table = jax.random.normal(keys[0], (vocab_size, C), jnp.float32)
    embed_table = embed_table.at[0].set(0.0)

    def conv_init(kw, kb):
        # PyTorch Conv1d weight shape (C_out, C_in, 3); stored here as (3, C_in, C_out)
        # so that y[l] = sum_k x[l+k-1] @ w[k] + b.
        fan_in = C * 3
        bound = 1.0 / (fan_in ** 0.5)
        w_torch = jax.random.uniform(kw, (C, C, 3), jnp.float32, -bound, bound)
        b = jax.random.uniform(kb, (C,), jnp.float32, -bound, bound)
        return jnp.transpose(w_torch, (2, 1, 0)), b

    w1, b1 = conv_init(keys[1], keys[2])
    w2, b2 = conv_init(keys[3], keys[4])
    w3, b3 = conv_init(keys[5], keys[6])
    return embed_table, w1, b1, w2, b2, w3, b3


if __name__ == "__main__":
    # Small shapes: block_num unused in forward; embedding_num=8 -> C=32.
    vocab_size = 50
    embedding_num = 8
    B, L = 2, 16

    key = jax.random.PRNGKey(0)
    k_ids, k_params = jax.random.split(key)

    x_ids = jax.random.randint(k_ids, (B, L), minval=0, maxval=vocab_size,
                               dtype=jnp.int32)
    params = _init_params(k_params, vocab_size, embedding_num)

    out = target_representation_old(x_ids, *params)
    out = jax.block_until_ready(out)

    assert out.shape == (B, L, embedding_num * 4)

    ref = jax.block_until_ready(_reference(x_ids, *params))
    max_diff = float(jnp.max(jnp.abs(out - ref)))
    # bf16 MXU operands -> loose tolerance vs. the f32 reference.
    assert max_diff < 0.1, f"max abs diff vs reference: {max_diff}"

    print("KERNEL_OK")
</pallas_src>

<mosaic_0001>
module attributes {stable_mosaic.version = 11 : i64} {
  func.func @_target_rep_fused_kernel(%arg0: i32, %arg1: memref<16x1xi32, #tpu.memory_space<vmem>>, %arg2: memref<128x32xbf16, #tpu.memory_space<vmem>>, %arg3: memref<96x32xbf16, #tpu.memory_space<vmem>>, %arg4: memref<1x32xf32, #tpu.memory_space<vmem>>, %arg5: memref<96x32xbf16, #tpu.memory_space<vmem>>, %arg6: memref<1x32xf32, #tpu.memory_space<vmem>>, %arg7: memref<96x32xbf16, #tpu.memory_space<vmem>>, %arg8: memref<1x32xf32, #tpu.memory_space<vmem>>, %arg9: memref<16x32xf32, #tpu.memory_space<vmem>>) attributes {dimension_semantics = [#tpu.dimension_semantics<parallel>], iteration_bounds = array<i64: 2>, scalar_prefetch = 0 : i64, scratch_operands = 0 : i64, tpu.core_type = #tpu.core_type<tc>, window_params = [{transform_indices = @transform_0, window_bounds = array<i64: 16, 1>}, {pipeline_mode = #tpu.pipeline_mode<synchronous>, transform_indices = @transform_1, window_bounds = array<i64: 128, 32>}, {pipeline_mode = #tpu.pipeline_mode<synchronous>, transform_indices = @transform_2, window_bounds = array<i64: 96, 32>}, {pipeline_mode = #tpu.pipeline_mode<synchronous>, transform_indices = @transform_3, window_bounds = array<i64: 1, 32>}, {pipeline_mode = #tpu.pipeline_mode<synchronous>, transform_indices = @transform_4, window_bounds = array<i64: 96, 32>}, {pipeline_mode = #tpu.pipeline_mode<synchronous>, transform_indices = @transform_5, window_bounds = array<i64: 1, 32>}, {pipeline_mode = #tpu.pipeline_mode<synchronous>, transform_indices = @transform_6, window_bounds = array<i64: 96, 32>}, {pipeline_mode = #tpu.pipeline_mode<synchronous>, transform_indices = @transform_7, window_bounds = array<i64: 1, 32>}, {transform_indices = @transform_8, window_bounds = array<i64: 16, 32>}]} {
    %c0 = arith.constant 0 : index
    %c0_0 = arith.constant 0 : index
    %0 = vector.load %arg1[%c0, %c0_0] : memref<16x1xi32, #tpu.memory_space<vmem>>, vector<16x1xi32>
    %1 = tpu.iota {dimensions = array<i32: 1>} : vector<16x128xi32>
    %2 = vector.broadcast %0 : vector<16x1xi32> to vector<16x128xi32>
    %3 = arith.cmpi eq, %2, %1 : vector<16x128xi32>
    %cst = arith.constant 1.000000e+00 : f32
    %cst_1 = arith.constant 0.000000e+00 : f32
    %4 = vector.broadcast %cst : f32 to vector<16x128xf32>
    %5 = vector.broadcast %cst_1 : f32 to vector<16x128xf32>
    %6 = arith.select %3, %4, %5 : vector<16x128xi1>, vector<16x128xf32>
    %7 = arith.truncf %6 : vector<16x128xf32> to vector<16x128xbf16>
    %c0_2 = arith.constant 0 : index
    %c0_3 = arith.constant 0 : index
    %8 = vector.load %arg2[%c0_2, %c0_3] : memref<128x32xbf16, #tpu.memory_space<vmem>>, vector<128x32xbf16>
    %cst_4 = arith.constant dense<0.000000e+00> : vector<16x32xf32>
    %9 = tpu.matmul %7, %8, %cst_4 {dimension_numbers = #tpu.dot_dimension_numbers<[1], [0], [0], [1], [0, 0, 1, 1], [], []>} : vector<16x128xbf16>, vector<128x32xbf16>, vector<16x32xf32> -> vector<16x32xf32>
    %10 = tpu.iota {dimensions = array<i32: 0>} : vector<16x1xi32>
    %c16_i32 = arith.constant 16 : i32
    %c0_i32 = arith.constant 0 : i32
    %11 = arith.cmpi eq, %c16_i32, %c0_i32 : i32
    %c1_i32 = arith.constant 1 : i32
    %12 = arith.select %11, %c1_i32, %c16_i32 : i32
    %13 = vector.broadcast %12 : i32 to vector<16x1xi32>
    %14 = arith.remsi %10, %13 : vector<16x1xi32>
    %c0_i32_5 = arith.constant 0 : i32
    %15 = vector.broadcast %c0_i32_5 : i32 to vector<16x1xi32>
    %16 = arith.cmpi ne, %14, %15 : vector<16x1xi32>
    %c0_i32_6 = arith.constant 0 : i32
    %17 = vector.broadcast %c0_i32_6 : i32 to vector<16x1xi32>
    %18 = arith.cmpi slt, %14, %17 : vector<16x1xi32>
    %c0_i32_7 = arith.constant 0 : i32
    %19 = arith.cmpi slt, %12, %c0_i32_7 : i32
    %20 = vector.broadcast %19 : i1 to vector<16x1xi1>
    %21 = vector.broadcast %20 : vector<16x1xi1> to vector<16x1xi1>
    %22 = arith.xori %18, %21 : vector<16x1xi1>
    %23 = arith.andi %22, %16 : vector<16x1xi1>
    %24 = vector.broadcast %12 : i32 to vector<16x1xi32>
    %25 = arith.addi %14, %24 : vector<16x1xi32>
    %26 = arith.select %23, %25, %14 : vector<16x1xi1>, vector<16x1xi32>
    %c0_i32_8 = arith.constant 0 : i32
    %27 = vector.broadcast %c0_i32_8 : i32 to vector<16x1xi32>
    %28 = arith.cmpi ne, %26, %27 : vector<16x1xi32>
    %29 = arith.extui %28 : vector<16x1xi1> to vector<16x1xi32>
    %30 = arith.sitofp %29 : vector<16x1xi32> to vector<16x1xf32>
    %c15_i32 = arith.constant 15 : i32
    %31 = vector.broadcast %c15_i32 : i32 to vector<16x1xi32>
    %32 = arith.cmpi ne, %26, %31 : vector<16x1xi32>
    %33 = arith.extui %32 : vector<16x1xi1> to vector<16x1xi32>
    %34 = arith.sitofp %33 : vector<16x1xi32> to vector<16x1xf32>
    %c1_i32_9 = arith.constant 1 : i32
    %35 = tpu.dynamic_rotate %9 by %c1_i32_9 dim 0 : vector<16x32xf32>, i32 -> vector<16x32xf32>
    %36 = vector.broadcast %30 : vector<16x1xf32> to vector<16x32xf32>
    %37 = arith.mulf %35, %36 : vector<16x32xf32>
    %c15_i32_10 = arith.constant 15 : i32
    %38 = tpu.dynamic_rotate %9 by %c15_i32_10 dim 0 : vector<16x32xf32>, i32 -> vector<16x32xf32>
    %39 = vector.broadcast %34 : vector<16x1xf32> to vector<16x32xf32>
    %40 = arith.mulf %38, %39 : vector<16x32xf32>
    %41 = arith.truncf %37 : vector<16x32xf32> to vector<16x32xbf16>
    %42 = arith.truncf %9 : vector<16x32xf32> to vector<16x32xbf16>
    %43 = arith.truncf %40 : vector<16x32xf32> to vector<16x32xbf16>
    %44 = tpu.concatenate %41, %42, %43 in 1 : vector<16x32xbf16>, vector<16x32xbf16>, vector<16x32xbf16> -> vector<16x96xbf16>
    %c0_11 = arith.constant 0 : index
    %c0_12 = arith.constant 0 : index
    %45 = vector.load %arg3[%c0_11, %c0_12] : memref<96x32xbf16, #tpu.memory_space<vmem>>, vector<96x32xbf16>
    %cst_13 = arith.constant dense<0.000000e+00> : vector<16x32xf32>
    %46 = tpu.matmul %44, %45, %cst_13 {dimension_numbers = #tpu.dot_dimension_numbers<[1], [0], [0], [1], [0, 0, 1, 1], [], []>} : vector<16x96xbf16>, vector<96x32xbf16>, vector<16x32xf32> -> vector<16x32xf32>
    %c0_14 = arith.constant 0 : index
    %c0_15 = arith.constant 0 : index
    %47 = vector.load %arg4[%c0_14, %c0_15] : memref<1x32xf32, #tpu.memory_space<vmem>>, vector<1x32xf32>
    %48 = vector.broadcast %47 : vector<1x32xf32> to vector<16x32xf32>
    %49 = arith.addf %46, %48 : vector<16x32xf32>
    %cst_16 = arith.constant 0.000000e+00 : f32
    %50 = vector.broadcast %cst_16 : f32 to vector<16x32xf32>
    %51 = arith.maximumf %49, %50 : vector<16x32xf32>
    %c1_i32_17 = arith.constant 1 : i32
    %52 = tpu.dynamic_rotate %51 by %c1_i32_17 dim 0 : vector<16x32xf32>, i32 -> vector<16x32xf32>
    %53 = vector.broadcast %30 : vector<16x1xf32> to vector<16x32xf32>
    %54 = arith.mulf %52, %53 : vector<16x32xf32>
    %c15_i32_18 = arith.constant 15 : i32
    %55 = tpu.dynamic_rotate %51 by %c15_i32_18 dim 0 : vector<16x32xf32>, i32 -> vector<16x32xf32>
    %56 = vector.broadcast %34 : vector<16x1xf32> to vector<16x32xf32>
    %57 = arith.mulf %55, %56 : vector<16x32xf32>
    %58 = arith.truncf %54 : vector<16x32xf32> to vector<16x32xbf16>
    %59 = arith.truncf %51 : vector<16x32xf32> to vector<16x32xbf16>
    %60 = arith.truncf %57 : vector<16x32xf32> to vector<16x32xbf16>
    %61 = tpu.concatenate %58, %59, %60 in 1 : vector<16x32xbf16>, vector<16x32xbf16>, vector<16x32xbf16> -> vector<16x96xbf16>
    %c0_19 = arith.constant 0 : index
    %c0_20 = arith.constant 0 : index
    %62 = vector.load %arg5[%c0_19, %c0_20] : memref<96x32xbf16, #tpu.memory_space<vmem>>, vector<96x32xbf16>
    %cst_21 = arith.constant dense<0.000000e+00> : vector<16x32xf32>
    %63 = tpu.matmul %61, %62, %cst_21 {dimension_numbers = #tpu.dot_dimension_numbers<[1], [0], [0], [1], [0, 0, 1, 1], [], []>} : vector<16x96xbf16>, vector<96x32xbf16>, vector<16x32xf32> -> vector<16x32xf32>
    %c0_22 = arith.constant 0 : index
    %c0_23 = arith.constant 0 : index
    %64 = vector.load %arg6[%c0_22, %c0_23] : memref<1x32xf32, #tpu.memory_space<vmem>>, vector<1x32xf32>
    %65 = vector.broadcast %64 : vector<1x32xf32> to vector<16x32xf32>
    %66 = arith.addf %63, %65 : vector<16x32xf32>
    %cst_24 = arith.constant 0.000000e+00 : f32
    %67 = vector.broadcast %cst_24 : f32 to vector<16x32xf32>
    %68 = arith.maximumf %66, %67 : vector<16x32xf32>
    %c1_i32_25 = arith.constant 1 : i32
    %69 = tpu.dynamic_rotate %68 by %c1_i32_25 dim 0 : vector<16x32xf32>, i32 -> vector<16x32xf32>
    %70 = vector.broadcast %30 : vector<16x1xf32> to vector<16x32xf32>
    %71 = arith.mulf %69, %70 : vector<16x32xf32>
    %c15_i32_26 = arith.constant 15 : i32
    %72 = tpu.dynamic_rotate %68 by %c15_i32_26 dim 0 : vector<16x32xf32>, i32 -> vector<16x32xf32>
    %73 = vector.broadcast %34 : vector<16x1xf32> to vector<16x32xf32>
    %74 = arith.mulf %72, %73 : vector<16x32xf32>
    %75 = arith.truncf %71 : vector<16x32xf32> to vector<16x32xbf16>
    %76 = arith.truncf %68 : vector<16x32xf32> to vector<16x32xbf16>
    %77 = arith.truncf %74 : vector<16x32xf32> to vector<16x32xbf16>
    %78 = tpu.concatenate %75, %76, %77 in 1 : vector<16x32xbf16>, vector<16x32xbf16>, vector<16x32xbf16> -> vector<16x96xbf16>
    %c0_27 = arith.constant 0 : index
    %c0_28 = arith.constant 0 : index
    %79 = vector.load %arg7[%c0_27, %c0_28] : memref<96x32xbf16, #tpu.memory_space<vmem>>, vector<96x32xbf16>
    %cst_29 = arith.constant dense<0.000000e+00> : vector<16x32xf32>
    %80 = tpu.matmul %78, %79, %cst_29 {dimension_numbers = #tpu.dot_dimension_numbers<[1], [0], [0], [1], [0, 0, 1, 1], [], []>} : vector<16x96xbf16>, vector<96x32xbf16>, vector<16x32xf32> -> vector<16x32xf32>
    %c0_30 = arith.constant 0 : index
    %c0_31 = arith.constant 0 : index
    %81 = vector.load %arg8[%c0_30, %c0_31] : memref<1x32xf32, #tpu.memory_space<vmem>>, vector<1x32xf32>
    %82 = vector.broadcast %81 : vector<1x32xf32> to vector<16x32xf32>
    %83 = arith.addf %80, %82 : vector<16x32xf32>
    %cst_32 = arith.constant 0.000000e+00 : f32
    %84 = vector.broadcast %cst_32 : f32 to vector<16x32xf32>
    %85 = arith.maximumf %83, %84 : vector<16x32xf32>
    %c0_33 = arith.constant 0 : index
    %c0_34 = arith.constant 0 : index
    %86 = vector.load %arg9[%c0_33, %c0_34] : memref<16x32xf32, #tpu.memory_space<vmem>>, vector<16x32xf32>
    tpu.vector_store %arg9[%c0_33, %c0_34], %85 {strides = array<i32>} : memref<16x32xf32, #tpu.memory_space<vmem>>, vector<16x32xf32>,
    return
  }
  func.func @transform_0(%arg0: i32) -> (i32, i32) {
    %c0_i32 = arith.constant 0 : i32
    %c0_i32_0 = arith.constant 0 : i32
    return %arg0, %c0_i32 : i32, i32
  }
  func.func @transform_1(%arg0: i32) -> (i32, i32) {
    %c0_i32 = arith.constant 0 : i32
    %c0_i32_0 = arith.constant 0 : i32
    %c0_i32_1 = arith.constant 0 : i32
    return %c0_i32, %c0_i32_0 : i32, i32
  }
  func.func @transform_2(%arg0: i32) -> (i32, i32) {
    %c0_i32 = arith.constant 0 : i32
    %c0_i32_0 = arith.constant 0 : i32
    %c0_i32_1 = arith.constant 0 : i32
    return %c0_i32, %c0_i32_0 : i32, i32
  }
  func.func @transform_3(%arg0: i32) -> (i32, i32) {
    %c0_i32 = arith.constant 0 : i32
    %c0_i32_0 = arith.constant 0 : i32
    %c0_i32_1 = arith.constant 0 : i32
    return %c0_i32, %c0_i32_0 : i32, i32
  }
  func.func @transform_4(%arg0: i32) -> (i32, i32) {
    %c0_i32 = arith.constant 0 : i32
    %c0_i32_0 = arith.constant 0 : i32
    %c0_i32_1 = arith.constant 0 : i32
    return %c0_i32, %c0_i32_0 : i32, i32
  }
  func.func @transform_5(%arg0: i32) -> (i32, i32) {
    %c0_i32 = arith.constant 0 : i32
    %c0_i32_0 = arith.constant 0 : i32
    %c0_i32_1 = arith.constant 0 : i32
    return %c0_i32, %c0_i32_0 : i32, i32
  }
  func.func @transform_6(%arg0: i32) -> (i32, i32) {
    %c0_i32 = arith.constant 0 : i32
    %c0_i32_0 = arith.constant 0 : i32
    %c0_i32_1 = arith.constant 0 : i32
    return %c0_i32, %c0_i32_0 : i32, i32
  }
  func.func @transform_7(%arg0: i32) -> (i32, i32) {
    %c0_i32 = arith.constant 0 : i32
    %c0_i32_0 = arith.constant 0 : i32
    %c0_i32_1 = arith.constant 0 : i32
    return %c0_i32, %c0_i32_0 : i32, i32
  }
  func.func @transform_8(%arg0: i32) -> (i32, i32) {
    %c0_i32 = arith.constant 0 : i32
    %c0_i32_0 = arith.constant 0 : i32
    return %arg0, %c0_i32 : i32, i32
  }
}

</mosaic_0001>

<bundles_post_ra>
// kernel: target_representation_old.1
= control target key start
LH: loop header
LB: loop body
LE: loop exit
PB: predicated region body
PF: predicated region fallthrough
CT: control target
= control target key end

     0   :  { %13 = vsyncpa [#allocation3], 0  ;;  %s1549_s0 = inlined_call_operand.vmem [shape: s32[32,1], index: 0, kind: input, shape index: {}]   ;;  %s1550_s1 = inlined_call_operand.vmem [shape: bf16[128,32], index: 1, kind: input, shape index: {}]   ;;  %s1551_s2 = inlined_call_operand.vmem [shape: bf16[96,32], index: 2, kind: input, shape index: {}]   ;;  %s1552_s3 = inlined_call_operand.vmem [shape: f32[1,32], index: 3, kind: input, shape index: {}]   ;;  %s1553_s4 = inlined_call_operand.vmem [shape: bf16[96,32], index: 4, kind: input, shape index: {}]   ;;  %s1554_s5 = inlined_call_operand.vmem [shape: f32[1,32], index: 5, kind: input, shape index: {}]   ;;  %s1555_s6 = inlined_call_operand.vmem [shape: bf16[96,32], index: 6, kind: input, shape index: {}]   ;;  %s1556_s7 = inlined_call_operand.vmem [shape: f32[1,32], index: 7, kind: input, shape index: {}]   ;;  %s1557_s8 = inlined_call_operand.hbm [shape: f32[32,32], index: 8, kind: output, shape index: {}]  }
   0x1   :  { %15 = vsyncpa [#allocation3 + $0x1], 0  ;;  %s1267_s27 = smov 0   ;;  %s1269_s28 = smov 0  }
   0x2   :  { %s1271_s29 = smov 0   ;;  %s1273_s30 = smov 0  }
   0x3 LB: > { %s1288_s9 = sadd.s32 4294967295, %s1211_s30   ;;  %s928_s10 = sadd.s32 4294967294, %s1211_s30   ;;  %s1211_s30 = sphi %s1273_s30, %s1563_s30   ;;  %s1207_s29 = sphi %s1271_s29, %s1562_s29   ;;  %s1203_s28 = sphi %s1269_s28, %s1561_s28   ;;  %s1199_s27 = sphi %s1267_s27, %s1560_s27  }
   0x4   : > { %s1292_s11 = sadd.s32 1, %s1211_s30   ;;  %s201_s12 = sadd.s32 1, %s1207_s29 }
   0x5   : > { %s198_s13 = ssub.s32 %s1211_s30, %s1292_s11  ;;  %p211_p0 = scmp.ne.s32.totalorder %s1207_s29, %s1203_s28 }
   0x6   : > { %p199_p1 = scmp.eq.s32.totalorder %s198_s13, 0  ;;  %p212_p2 = scmp.eq.s32.totalorder %s1288_s9, 1 }
   0x7   : > { %p217_p3 = scmp.ne.s32.totalorder %s1203_s28, %s1199_s27  ;;  %p218_p4 = scmp.eq.s32.totalorder %s928_s10, 1 }
   0x8   : > { %s1303_s14 = scalar_select %p199_p1, %s1207_s29, %s201_s12  }
   0x9   : > { %p1305_p5 = por %p212_p2, %p211_p0  ;;  %p1309_p6 = por %p218_p4, %p217_p3 }
   0xa   : > { %p931_p7 = scmp.ge.s32.totalorder %s1211_s30, 1  ;;  %p266_p8 = scmp.lt.s32.totalorder %s1211_s30, 3 }
   0xc   : > { %p267_p9 = pnand %p931_p7, %p266_p8 }
   0xd   : > { %s933_s17 = sshll.u32 (!%p267_p9), %s1288_s9, 1  ;;  %v1123_v0 = vld [vmem:[%s1550_s1] sm:$0xff] (!%p267_p9)   ;;  %v1213_v1 = vmov (!%p267_p9), 0   ;;  %v1214_v2 = vmov (!%p267_p9), 0.0   ;;  %v1124_v3 = vld [vmem:[%s1550_s1 + $0x8] sm:$0xff] (!%p267_p9)   ;;  %v1125_v4 = vld [vmem:[%s1550_s1 + $0x10] sm:$0xff] (!%p267_p9)   ;;  %v310_v12 = vlaneseq (!%p267_p9) }
   0xe   : > { %270 = sbr.rel (%p267_p9) target bundleno = 1411 (0x583), region = 52  ;;  %1122 = vset.pattern.permute.xlu0 (!%p267_p9), %v1213_v1  ;;  %p301_p10 = scmp.lt.s32.totalorder (!%p267_p9), %s933_s17, 3  ;;  %1007 = vmatprep.subr.bf16.mxu0 (!%p267_p9), %v1214_v2  ;;  %v1126_v7 = vld [vmem:[%s1550_s1 + $0x18] sm:$0xff] (!%p267_p9)   ;;  %v1127_v8 = vld [vmem:[%s1550_s1 + $0x20] sm:$0xff] (!%p267_p9)   ;;  %vm1215_vm0 = vmmov (!%p267_p9), 0   ;;  %v1128_v9 = vld [vmem:[%s1550_s1 + $0x28] sm:$0xff] (!%p267_p9)  }
   0xf   : > { %1008 = vmatpush3.bf16.msra.mxu0 (!%p267_p9), %v1123_v0  ;;  %1027 = vmatprep.subr.bf16.mxu1 (!%p267_p9), %v1214_v2  ;;  %v1129_v10 = vld [vmem:[%s1550_s1 + $0x30] sm:$0xff] (!%p267_p9)   ;;  %v1130_v11 = vld [vmem:[%s1550_s1 + $0x38] sm:$0xff] (!%p267_p9)   ;;  %v311_v14 = vand.u32 (!%p267_p9), 127, %v310_v12  ;;  %v1216_v16 = vmov (!%p267_p9), 1.0|1.0   ;;  %v1131_v17 = vld [vmem:[%s1551_s2] sm:$0xff] (!%p267_p9)  }
  0x10   : > { %1009 = vmatprep.subr.bf16.mxu0 (!%p267_p9), %v1214_v2  ;;  %1023 = vmatprep.mubr.msk.bf16.mxu0 (!%p267_p9), %vm1215_vm0, %v1214_v2  ;;  %v1132_v18 = vld [vmem:[%s1551_s2 + $0x8] sm:$0xff] (!%p267_p9)   ;;  %v1133_v19 = vld [vmem:[%s1551_s2 + $0x10] sm:$0xff] (!%p267_p9)   ;;  %v1134_v20 = vld [vmem:[%s1551_s2 + $0x18] sm:$0xff] (!%p267_p9)   ;;  %v1379_v22 = vshrl.u32 (!%p267_p9), %v310_v12, 7  ;;  %s1217_s24 = smov (!%p267_p9), 32   ;;  %vm490_vm8 = vcmask (!%p267_p9), 261120  }
  0x11   : > { %1039 = vmatprep.mubr.msk.bf16.mxu1 (!%p267_p9), %vm1215_vm0, %v1214_v2  ;;  %1028 = vmatpush3.bf16.msra.mxu1 (!%p267_p9), %v1131_v17  ;;  %v1135_v21 = vld [vmem:[%s1551_s2 + $0x20] sm:$0xff] (!%p267_p9)   ;;  %v1136_v24 = vld [vmem:[%s1551_s2 + $0x28] sm:$0xff] (!%p267_p9)   ;;  %vm494_vm9 = vcmask (!%p267_p9), 523264   ;;  %vm552_vm10 = vcmask (!%p267_p9), 785408   ;;  %v1139_v52 = vld [vmem:[%s1553_s4 + $0x10] sm:$0xff] (!%p267_p9)  }
  0x12   : > { %1029 = vmatprep.subr.bf16.mxu1 (!%p267_p9), %v1214_v2  ;;  %v430_v23 = vadd.s32 (!%p267_p9), 8, %v1379_v22  ;;  %v435_v26 = vand.u32 (!%p267_p9), 15, %v1379_v22  ;;  %vm469_vm6 = vcmp.lt.s32.totalorder (!%p267_p9), %v1379_v22, 1  ;;  %vm476_vm7 = vcmp.lt.s32.totalorder (!%p267_p9), %v1379_v22, 7  ;;  %v1137_v50 = vld [vmem:[%s1553_s4] sm:$0xff] (!%p267_p9)   ;;  %v1138_v51 = vld [vmem:[%s1553_s4 + $0x8] sm:$0xff] (!%p267_p9)  }
  0x13   : > { %1010 = vmatpush3.bf16.msra.mxu0 (!%p267_p9), %v1124_v3  ;;  %v1140_v53 = vld [vmem:[%s1553_s4 + $0x18] sm:$0xff] (!%p267_p9)   ;;  %v1141_v54 = vld [vmem:[%s1553_s4 + $0x20] sm:$0xff] (!%p267_p9)   ;;  %v1142_v55 = vld [vmem:[%s1553_s4 + $0x28] sm:$0xff] (!%p267_p9)  }
  0x14   : > { %1011 = vmatprep.subr.bf16.mxu0 (!%p267_p9), %v1214_v2  ;;  %v442_v25 = vand.u32 (!%p267_p9), 15, %v430_v23  ;;  %vm455_vm5 = vcmp.ne.s32.totalorder (!%p267_p9), %v435_v26, 0  ;;  %v947_v56 = vld [vmem:[%s1552_s3] ss:$0 sm:$0xff] (!%p267_p9)  ;;  %v1146_v23 = vld [vmem:[%s1555_s6 + $0x18] sm:$0xff] (!%p267_p9)  }
  0x15   : > { %s1565_s17 = smov (!%p301_p10, %s933_s17), 3  ;;  %1030 = vmatpush3.bf16.msra.mxu1 %v1132_v18  ;;  %v1393_v32 = vsel %vm455_vm5, 1.0, %v1214_v2  ;;  %v955_v26 = vld [vmem:[%s1554_s5] ss:$0 sm:$0xff] }
  0x16   : > { %s934_s22 = sshll.u32 %s1565_s17, 3  ;;  %1031 = vmatprep.subr.bf16.mxu1 %v1214_v2  ;;  %vm462_vm4 = vcmp.ne.s32.totalorder %v442_v25, 15  ;;  %v1148_v25 = vld [vmem:[%s1555_s6 + $0x28] sm:$0xff]   ;;  %v963_v22 = vld [vmem:[%s1556_s7] ss:$0 sm:$0xff]  ;;  %s1219_s17 = smov [#allocation2]  }
  0x17   : > { %s304_s25 = scalar_lea.vmem %s1549_s0, %s934_s22  ;;  %1012 = vmatpush3.bf16.msra.mxu0 %v1125_v4  ;;  %v1389_v31 = vsel %vm462_vm4, 1.0, %v1214_v2  ;;  %s1153_s18 = sshll.u32 %s1219_s17, 4  ;;  %s1154_s18 = int_to_ptr.vmem [resolvable:$false] %s1153_s18 }
  0x18   : > { %v308_v5 = vld [vmem:[%s304_s25] sm:$0xff]  ;;  %v309_v6 = vld [vmem:[%s304_s25 + $0x8] sm:$0xff]  ;;  %1013 = vmatprep.subr.bf16.mxu0 %v1214_v2  ;;  %s1218_s25 = smov 64  }
  0x19   : > { %313 = vperm.xlu0 %1122, %v308_v5   ;;  %1032 = vmatpush3.bf16.msra.mxu1 %v1133_v19  ;;  %v1143_v19 = vld [vmem:[%s1555_s6] sm:$0xff]  }
  0x1a   : > { %1033 = vmatprep.subr.bf16.mxu1 %v1214_v2 }
  0x1b   : > { %1014 = vmatpush3.bf16.msra.mxu0 %v1126_v7 }
  0x1c   : > { %1015 = vmatprep.subr.bf16.mxu0 %v1214_v2 }
  0x1d   : > { %316 = vperm.xlu0 %1122, %v309_v6   ;;  %1034 = vmatpush3.bf16.msra.mxu1 %v1134_v20  ;;  %v1144_v20 = vld [vmem:[%s1555_s6 + $0x8] sm:$0xff]  }
  0x1e   : > { %1035 = vmatprep.subr.bf16.mxu1 %v1214_v2 }
  0x1f   : > { %1016 = vmatpush3.bf16.msra.mxu0 %v1127_v8 }
  0x20   : > { %1017 = vmatprep.subr.bf16.mxu0 %v1214_v2 }
  0x21   : > { %1036 = vmatpush3.bf16.msra.mxu1 %v1135_v21  ;;  %v1145_v21 = vld [vmem:[%s1555_s6 + $0x10] sm:$0xff]  }
  0x22   : > { %1037 = vmatprep.subr.bf16.mxu1 %v1214_v2 }
  0x23   : > { %1018 = vmatpush3.bf16.msra.mxu0 %v1128_v9 }
  0x24   : > { %1019 = vmatprep.subr.bf16.mxu0 %v1214_v2 }
  0x25   : > { %1038 = vmatpush3.bf16.msra.mxu1 %v1136_v24  ;;  %v1147_v24 = vld [vmem:[%s1555_s6 + $0x20] sm:$0xff]  }
  0x26   : > { %1043 = vmatprep.subr.bf16.mxu1 %v1214_v2 }
  0x27   : > { %1020 = vmatpush3.bf16.msra.mxu0 %v1129_v10 }
  0x28   : > { %1021 = vmatprep.subr.bf16.mxu0 %v1214_v2 }
  0x2b   : > { %1022 = vmatpush3.bf16.msra.mxu0 %v1130_v11 }
  0x2c   : > { %1059 = vmatprep.subr.bf16.mxu0 %v1214_v2 }
  0x98   : > { %v314_v13 = vpop.permute.xlu0 %313 }
  0x99   : > { %vm318_vm1 = vcmp.eq.s32.totalorder %v314_v13, %v311_v14 }
  0x9c   : > { %v317_v15 = vpop.permute.xlu0 %316 }
  0x9d   : > { %vm319_vm2 = vcmp.eq.s32.totalorder %v317_v15, %v311_v14 }
  0x9e   : > { %vm943_vm3 = vmpackc.low %vm319_vm2, %vm318_vm1 }
  0x9f   : > { %1024 = vmatmul.mubr.msk.bf16.vlgmr.msra.gmra.mrb[0].mxu0 %vm943_vm3, %v1216_v16 }
  0xa0   : > { %1071 = vmatprep.mubr.msk.bf16.mxu0 %vm1215_vm0, %v1214_v2  ;;  %1060 = vmatpush3.bf16.msra.mxu0 %v1143_v19 }
  0xa1   : > { %1061 = vmatprep.subr.bf16.mxu0 %v1214_v2 }
  0xa4   : > { %1062 = vmatpush3.bf16.msra.mxu0 %v1144_v20 }
  0xa5   : > { %1063 = vmatprep.subr.bf16.mxu0 %v1214_v2 }
  0xa8   : > { %1064 = vmatpush3.bf16.msra.mxu0 %v1145_v21 }
  0xa9   : > { %1065 = vmatprep.subr.bf16.mxu0 %v1214_v2 }
  0xac   : > { %1066 = vmatpush3.bf16.msra.mxu0 %v1146_v23 }
  0xad   : > { %1067 = vmatprep.subr.bf16.mxu0 %v1214_v2 }
  0xb0   : > { %1068 = vmatpush3.bf16.msra.mxu0 %v1147_v24 }
  0xb1   : > { %1069 = vmatprep.subr.bf16.mxu0 %v1214_v2 }
  0xb4   : > { %1070 = vmatpush3.bf16.msra.mxu0 %v1148_v25 }
 0x172   : > { %v421_v27 = vpop.f32.mrb[0].mxu0 }
 0x173   : > { %v1025_v28 = vpop.f32.mrb[1].mxu0  ;;  %v467_v29 = vrot.slane %v421_v27, 7  ;;  %v474_v33 = vrot.slane %v421_v27, 1 }
 0x174   : > { %v424_v30 = vpop.f32.mrb[2].mxu0 }
 0x175   : > { %v468_v34 = vrot.slane %v424_v30, 7  ;;  %v475_v35 = vrot.slane %v424_v30, 1  ;;  %v1026_v36 = vpop.f32.mrb[3].mxu0  ;;  %v482_v37 = vpack.c.bf16 %v424_v30, %v421_v27 }
 0x177   : > { %v471_v38 = vsel %vm469_vm6, %v468_v34, %v467_v29  ;;  %485 = vrot.lane.b32.xlu1 %v482_v37, %s1217_s24  ;;  %v477_v39 = vsel %vm476_vm7, %v474_v33, %v475_v35  ;;  %v478_v40 = vsel %vm476_vm7, %v475_v35, %v474_v33  ;;  %v470_v41 = vsel %vm469_vm6, %v467_v29, %v468_v34 }
 0x178   : > { %v480_v42 = vmul.f32 %v1389_v31, %v478_v40  ;;  %v472_v43 = vmul.f32 %v1393_v32, %v471_v38 }
 0x17a   : > { %v483_v44 = vpack.c.bf16 %v480_v42, %v477_v39  ;;  %v481_v45 = vpack.c.bf16 %v470_v41, %v472_v43 }
 0x17c   : > { %488 = vrot.lane.b32.xlu1 %v483_v44, %s1218_s25 }
 0x1e9   : > { %v486_v46 = vpop.permute.xlu1 %485 }
 0x1ea   : > { %v493_v47 = vsel %vm490_vm8, %v481_v45, %v486_v46 }
 0x1ee   : > { %v489_v48 = vpop.permute.xlu1 %488 }
 0x1ef   : > { %v496_v49 = vsel %vm494_vm9, %v493_v47, %v489_v48 }
 0x1f0   : > { %1040 = vmatmul.mubr.msk.bf16.vlgmr.msra.gmra.mrb[0].mxu1 %vm552_vm10, %v496_v49 }
 0x1f1   : > { %1055 = vmatprep.mubr.msk.bf16.mxu1 %vm1215_vm0, %v1214_v2  ;;  %1044 = vmatpush3.bf16.msra.mxu1 %v1137_v50 }
 0x1f2   : > { %1045 = vmatprep.subr.bf16.mxu1 %v1214_v2 }
 0x1f5   : > { %1046 = vmatpush3.bf16.msra.mxu1 %v1138_v51 }
 0x1f6   : > { %1047 = vmatprep.subr.bf16.mxu1 %v1214_v2 }
 0x1f9   : > { %1048 = vmatpush3.bf16.msra.mxu1 %v1139_v52 }
 0x1fa   : > { %1049 = vmatprep.subr.bf16.mxu1 %v1214_v2 }
 0x1fd   : > { %1050 = vmatpush3.bf16.msra.mxu1 %v1140_v53 }
 0x1fe   : > { %1051 = vmatprep.subr.bf16.mxu1 %v1214_v2 }
 0x201   : > { %1052 = vmatpush3.bf16.msra.mxu1 %v1141_v54 }
 0x202   : > { %1053 = vmatprep.subr.bf16.mxu1 %v1214_v2 }
 0x205   : > { %1054 = vmatpush3.bf16.msra.mxu1 %v1142_v55 }
 0x2c3   : > { %v589_v57 = vpop.f32.mrb[0].mxu1 }
 0x2c4   : > { %v590_v58 = vadd.f32 %v947_v56, %v589_v57  ;;  %v1041_v59 = vpop.f32.mrb[1].mxu1 }
 0x2c5   : > { %v592_v60 = vpop.f32.mrb[2].mxu1 }
 0x2c6   : > { %v596_v61 = vmax.f32 %v590_v58, 0.0  ;;  %v593_v62 = vadd.f32 %v947_v56, %v592_v60  ;;  %v1042_v63 = vpop.f32.mrb[3].mxu1 }
 0x2c8   : > { %v597_v0 = vmax.f32 %v593_v62, 0.0  ;;  %v598_v1 = vrot.slane %v596_v61, 7  ;;  %v604_v3 = vrot.slane %v596_v61, 1 }
 0x2ca   : > { %v599_v4 = vrot.slane %v597_v0, 7  ;;  %v605_v5 = vrot.slane %v597_v0, 1  ;;  %v611_v6 = vpack.c.bf16 %v597_v0, %v596_v61 }
 0x2cc   : > { %614 = vrot.lane.b32.xlu0 %v611_v6, %s1217_s24  ;;  %v606_v7 = vsel %vm476_vm7, %v604_v3, %v605_v5  ;;  %v607_v8 = vsel %vm476_vm7, %v605_v5, %v604_v3  ;;  %v600_v9 = vsel %vm469_vm6, %v598_v1, %v599_v4  ;;  %v601_v10 = vsel %vm469_vm6, %v599_v4, %v598_v1 }
 0x2cd   : > { %v609_v11 = vmul.f32 %v1389_v31, %v607_v8  ;;  %v602_v12 = vmul.f32 %v1393_v32, %v601_v10 }
 0x2cf   : > { %v612_v13 = vpack.c.bf16 %v609_v11, %v606_v7  ;;  %v610_v14 = vpack.c.bf16 %v600_v9, %v602_v12 }
 0x2d1   : > { %617 = vrot.lane.b32.xlu1 %v612_v13, %s1218_s25 }
 0x33e   : > { %v615_v15 = vpop.permute.xlu0 %614 }
 0x33f   : > { %v621_v16 = vsel %vm490_vm8, %v610_v14, %v615_v15 }
 0x343   : > { %v618_v17 = vpop.permute.xlu1 %617 }
 0x344   : > { %v623_v18 = vsel %vm494_vm9, %v621_v16, %v618_v17 }
 0x345   : > { %1056 = vmatmul.mubr.msk.bf16.vlgmr.msra.gmra.mrb[4].mxu1 %vm552_vm10, %v623_v18 }
 0x418   : > { %v715_v27 = vpop.f32.mrb[4].mxu1 }
 0x419   : > { %v716_v28 = vadd.f32 %v955_v26, %v715_v27  ;;  %v1057_v29 = vpop.f32.mrb[5].mxu1 }
 0x41a   : > { %v718_v30 = vpop.f32.mrb[6].mxu1 }
 0x41b   : > { %v722_v33 = vmax.f32 %v716_v28, 0.0  ;;  %v719_v34 = vadd.f32 %v955_v26, %v718_v30  ;;  %v1058_v35 = vpop.f32.mrb[7].mxu1 }
 0x41d   : > { %v723_v36 = vmax.f32 %v719_v34, 0.0  ;;  %v724_v37 = vrot.slane %v722_v33, 7  ;;  %v730_v38 = vrot.slane %v722_v33, 1 }
 0x41f   : > { %v725_v2 = vrot.slane %v723_v36, 7  ;;  %v731_v39 = vrot.slane %v723_v36, 1  ;;  %v737_v40 = vpack.c.bf16 %v723_v36, %v722_v33 }
 0x421   : > { %740 = vrot.lane.b32.xlu0 %v737_v40, %s1217_s24  ;;  %v732_v41 = vsel %vm476_vm7, %v730_v38, %v731_v39  ;;  %v733_v42 = vsel %vm476_vm7, %v731_v39, %v730_v38  ;;  %v726_v43 = vsel %vm469_vm6, %v724_v37, %v725_v2  ;;  %v727_v44 = vsel %vm469_vm6, %v725_v2, %v724_v37  ;;  %s297_s24 = sand.u32 1, %s1203_s28  }
 0x422   : > { %v735_v45 = vmul.f32 %v1389_v31, %v733_v42  ;;  %v728_v46 = vmul.f32 %v1393_v32, %v727_v44  ;;  %s932_s19 = sshll.u32 %s297_s24, 4 }
 0x423   : > { %s299_s22 = scalar_lea.vmem [#allocation2], %s932_s19  ;;  %s1155_s19 = scalar_lea.vmem %s1154_s18, 512 }
 0x424   : > { %v738_v47 = vpack.c.bf16 %v735_v45, %v732_v41  ;;  %v736_v48 = vpack.c.bf16 %v726_v43, %v728_v46  ;;  %s866_s23 = sshll.u32 %s299_s22, 4  ;;  %s1499_s23 = int_to_ptr.vmem [resolvable:$true] %s866_s23 }
 0x425   : > { %s1149_s13 = scalar_lea.vmem %s1499_s23, 256  ;;  %p1156_p0 = scmp.lt.s32.totalorder %s1499_s23, %s1154_s18 }
 0x426   : > { %743 = vrot.lane.b32.xlu1 %v738_v47, %s1218_s25  ;;  %s976_s25 = sshll.u32 %s1288_s9, 8  ;;  %s1508_s9 = scalar_lea.sflag [#allocation3], %s297_s24 }
 0x427   : > { %s1504_s12 = scalar_lea.hbm %s1557_s8, %s976_s25  ;;  %p1150_p11 = scmp.ne.s32.totalorder %s1499_s23, %s1149_s13 }
 0x428   : > { %p1157_p1 = scmp.lt.s32.totalorder %s1155_s19, %s1149_s13 }
 0x429   : > { %p1151_p12 = pnand %p1150_p11, %p1305_p5 }
 0x42a   : > { %p1158_p2 = por %p1157_p1, %p1156_p0 }
 0x42b   : > { %p1152_p13 = pneg %p1151_p12 }
 0x42d   : > { %p1159_p3 = pnand %p1158_p2, %p1152_p13 }
 0x493   : > { %v741_v49 = vpop.permute.xlu0 %740 }
 0x494   : > { %v747_v50 = vsel %vm490_vm8, %v736_v48, %v741_v49 }
 0x498   : > { %v744_v51 = vpop.permute.xlu1 %743 }
 0x499   : > { %v749_v52 = vsel %vm494_vm9, %v747_v50, %v744_v51 }
 0x49a   : > { %1072 = vmatmul.mubr.msk.bf16.vlgmr.msra.gmra.mrb[4].mxu0 %vm552_vm10, %v749_v52 }
 0x56d   : > { %v841_v31 = vpop.f32.mrb[4].mxu0 }
 0x56e   : > { %v842_v32 = vadd.f32 %v963_v22, %v841_v31  ;;  %v1073_v53 = vpop.f32.mrb[5].mxu0 }
 0x56f   : > { %v844_v54 = vpop.f32.mrb[6].mxu0 }
 0x570   : > { %v848_v55 = vmax.f32 %v842_v32, 0.0  ;;  %v845_v56 = vadd.f32 %v963_v22, %v844_v54  ;;  %v1074_v57 = vpop.f32.mrb[7].mxu0 }
 0x572   : > { %850 = vst.msk [vmem:[%s299_s22] sm:$0xff] %vm490_vm8, %v848_v55  ;;  %v849_v58 = vmax.f32 %v845_v56, 0.0 }
 0x574   : > { %851 = vst.msk [vmem:[%s299_s22 + $0x8] sm:$0xff] %vm490_vm8, %v849_v58 }
 0x575   : > { %1162 = shalt.err (!%p1159_p3)
}
 0x576   : > { %s1163_s24 = scalar_lea.hbm %s1504_s12, 256  ;;  %s1167_s22 = scalar_lea.hbm %s1557_s8, 512 }
 0x577   : > { %p1164_p4 = scmp.ne.s32.totalorder %s1504_s12, %s1163_s24  ;;  %p1168_p9 = scmp.lt.u32.totalorder %s1504_s12, %s1557_s8 }
 0x578   : > { %p1169_p10 = scmp.lt.u32.totalorder %s1167_s22, %s1163_s24  ;;  %p1171_p12 = scmp.lt.u32.totalorder %s1163_s24, %s1504_s12 }
 0x579   : > { %p1165_p7 = pnand %p1164_p4, %p1305_p5 }
 0x57a   : > { %p1170_p11 = por %p1169_p10, %p1168_p9 }
 0x57b   : > { %p1166_p8 = pneg %p1165_p7 }
 0x57c   : > { %p1172_p13 = por %p1171_p12, %p1170_p11 }
 0x57e   : > { %p1173_p0 = pnand %p1172_p13, %p1166_p8 }
 0x580   : > { %1176 = shalt.err (!%p1173_p0)
}
 0x581   : > { %s1220_s10 = smov 128   ;;  %s1221_s13 = smov 8  }
 0x582   : > { %1075 = dma.vmem_to_hbm [thread:$0]  (%p1305_p5), %s1499_s23, 256, %s1504_s12, %s1508_s9, %s1220_s10, %s1220_s10, %s1221_s13  }
 0x583 PF: > { %p1081_p1 = scmp.ge.s32.totalorder %s1211_s30, 2  ;;  %s881_s17 = sand.u32 1, %s1199_s27  }
 0x584   : > { %s882_s18 = scalar_lea.sflag [#allocation3], %s881_s17 }
 0x585   : > { %p1078_p2 = pnand %p1081_p1, %p1309_p6 }
 0x587   : > { %1194 = dma.done.wait (!%p1078_p2), %s882_s18, 256  }
 0x588   : > { %1196 = vsyncadd (!%p1078_p2), %s882_s18, 4294967040  ;;  %p18_p3 = scmp.ge.s32.totalorder %s1292_s11, 4   ;;  %s1560_s27 = smov %s1203_s28 }
 0x589   : > { %s1561_s28 = smov %s1207_s29  ;;  %s1562_s29 = smov %s1303_s14 }
 0x58a   : > { %s1563_s30 = smov %s1292_s11  ;;  %20 = sbr.rel (!%p18_p3) target bundleno = 3 (0x3), region = 87 }
 0x591   :  { %887 = vsyncpa [#allocation3], 1 }
 0x592   :  { %889 = vsyncpa [#allocation3 + $0x1], 1 }

</bundles_post_ra>
